<compile_context>
chip_gen: v7x
topology: tpu7x:2x2x1
jax: 0.10.0
libtpu: 0.0.40
codegen_flags: <defaults>
</compile_context>

<pallas_src>
import functools
import math

import numpy as np

import jax
import jax.numpy as jnp
from jax import lax
from jax.experimental import pallas as pl
from jax.experimental.pallas import tpu as pltpu


# ----------------------------- helpers ------------------------------------- #

def _round_up(x, m):
    return ((x + m - 1) // m) * m


def _pick_tile(dim, candidates):
    """Largest candidate tile that evenly divides `dim` (fallback: full dim)."""
    for c in candidates:
        if c <= dim and dim % c == 0:
            return c
    return dim


# ----------------------------- Pallas kernel ------------------------------- #

def _equal_linear_kernel(x_ref, w_ref, b_ref, o_ref, *, scale):
    """One (tm, tn) output tile; K is reduced over grid axis 2.

    x_ref : (tm, tk)   activation tile
    w_ref : (tn, tk)   weight_orig tile (out_dim-major — NOT transposed)
    b_ref : (1,  tn)   bias tile
    o_ref : (tm, tn)   f32 output tile; its index_map ignores k, so the block
                       stays VMEM-resident across the K axis and doubles as
                       the accumulator.
    """
    k = pl.program_id(2)

    # bf16 MXU operands, f32 accumulation (cast at tile level; VPU-cheap).
    xb = x_ref[...].astype(jnp.bfloat16)
    wb = w_ref[...].astype(jnp.bfloat16)

    # Contract the shared K (last) axis of both tiles: (tm,tk) . (tn,tk)^T.
    part = lax.dot_general(xb, wb, (((1,), (1,)), ((), ())),
                           preferred_element_type=jnp.float32)

    @pl.when(k == 0)
    def _first():
        o_ref[...] = part

    @pl.when(k > 0)
    def _accumulate():
        o_ref[...] += part

    @pl.when(k == pl.num_programs(2) - 1)
    def _finalize():
        # EqualLR scale on the full accumulated product, then bias (one VPU pass).
        o_ref[...] = o_ref[...] * scale + b_ref[...]


# ---------------------------- JAX-side wrapper ------------------------------ #

def equal_linear_forward(x, weight_orig, bias):
    """EqualLinear forward: x @ (weight_orig * sqrt(2/fan_in)).T + bias.

    x           : (..., in_dim)
    weight_orig : (out_dim, in_dim)
    bias        : (out_dim,)
    returns     : (..., out_dim), dtype of x
    """
    out_dim, in_dim = weight_orig.shape
    fan_in = in_dim  # weight.size(1) * weight[0][0].numel() == in_dim for nn.Linear
    scale = math.sqrt(2.0 / fan_in)

    lead = x.shape[:-1]
    M = int(np.prod(lead)) if lead else 1
    K = in_dim
    N = out_dim

    x2 = x.reshape(M, K)
    w = weight_orig                     # (N, K): read directly, no transpose
    b = bias

    # --- padding ----------------------------------------------------------- #
    # M: sublane granularity only (8 sublanes for 32-bit refs, 16 if packed).
    sub = 8 if jnp.dtype(x2.dtype).itemsize == 4 else 16
    pM = _round_up(M, sub)
    # N: pad to a lane multiple so the output store is lane-dense / unmasked.
    pN = _round_up(N, 128)
    # K: never padded.  If it is not a 128-multiple, use the full K as one
    # block (block dim == full array dim is allowed); padding K only wastes
    # MXU and DMA work on the contraction axis.
    if K % 128 == 0:
        tk = _pick_tile(K, (2048, 1024, 512, 256, 128))
    else:
        tk = K

    if pM != M:
        x2 = jnp.pad(x2, ((0, pM - M), (0, 0)))
    if pN != N:
        w = jnp.pad(w, ((0, pN - N), (0, 0)))
        b2 = jnp.pad(b, (0, pN - N)).reshape(1, pN)
    else:
        b2 = b.reshape(1, N)

    # --- tile selection ----------------------------------------------------- #
    tm = _pick_tile(pM, (512, 256, 128, 64, 32, 16, 8))
    # Prefer 256-multiples for N (v6e/v7x MXU is 256x256)...
    tn = _pick_tile(pN, (512, 256, 128))
    # ...but keep >= 2 blocks along a parallel grid axis when possible so both
    # v7x TensorCores get work (no effect on single-TC v5e/v6e).
    if pM // tm < 2 and pN // tn < 2 and tn > 128:
        for cand in (256, 128):
            if cand < tn and pN % cand == 0:
                tn = cand
                break

    # Weight-stream buffering: deepen to 3 when more than one weight block is
    # streamed (small-M, weight-HBM-bound regime).
    n_w_blocks = (pN // tn) * (K // tk)
    w_bufs = 3 if n_w_blocks > 1 else 2

    # --- VMEM budget: <= ~40 MiB working set so it also fits v7x (64 MiB) --- #
    itemsize = 4  # refs stay in their HBM dtype (f32 here); bf16 exists only in vregs

    def vmem_bytes(tm_, tn_, tk_):
        return itemsize * (2 * tm_ * tk_          # x   (double-buffered)
                           + w_bufs * tn_ * tk_   # w   (2- or 3-deep)
                           + 2 * tn_              # bias
                           + 2 * tm_ * tn_)       # out (double-buffered)

    budget = 40 * 1024 * 1024
    while vmem_bytes(tm, tn, tk) > budget and tk % 256 == 0:
        tk //= 2
    while vmem_bytes(tm, tn, tk) > budget and tn % 256 == 0:
        tn //= 2
    while vmem_bytes(tm, tn, tk) > budget and tm % 16 == 0:
        tm //= 2

    grid = (pM // tm, pN // tn, K // tk)

    w_spec_kwargs = {}
    if n_w_blocks > 1:
        w_spec_kwargs["pipeline_mode"] = pl.Buffered(3)
    w_spec = pl.BlockSpec((tn, tk), lambda i, j, k: (j, k), **w_spec_kwargs)

    flops = 2 * M * K * N
    bytes_accessed = itemsize * (pM * K + pN * K + pM * pN + pN)

    out_padded = pl.pallas_call(
        functools.partial(_equal_linear_kernel, scale=scale),
        out_shape=jax.ShapeDtypeStruct((pM, pN), jnp.float32),
        grid_spec=pltpu.PrefetchScalarGridSpec(
            num_scalar_prefetch=0,
            grid=grid,
            in_specs=[
                pl.BlockSpec((tm, tk), lambda i, j, k: (i, k)),   # x
                w_spec,                                           # weight_orig
                pl.BlockSpec((1, tn), lambda i, j, k: (0, j)),    # bias
            ],
            out_specs=pl.BlockSpec((tm, tn), lambda i, j, k: (i, j)),
        ),
        compiler_params=pltpu.CompilerParams(
            dimension_semantics=("parallel", "parallel", "arbitrary"),
            vmem_limit_bytes=48 * 1024 * 1024),
        cost_estimate=pl.CostEstimate(
            flops=flops, transcendentals=0, bytes_accessed=bytes_accessed),
    )(x2, w, b2)

    out = out_padded[:M, :N]
    return out.reshape(*lead, N).astype(x.dtype)


# Pure-JAX reference (matches the PyTorch module's math exactly, f32).
def equal_linear_reference(x, weight_orig, bias):
    in_dim = weight_orig.shape[1]
    scale = math.sqrt(2.0 / in_dim)
    w = weight_orig * scale                                    # (out_dim, in_dim)
    return jnp.einsum("...k,nk->...n", x, w,
                      precision=lax.Precision.HIGHEST) + bias


# --------------------------------- main ------------------------------------- #

if __name__ == "__main__":
    key = jax.random.PRNGKey(0)
    batch, seq, in_dim, out_dim = 2, 8, 32, 64

    k_w, k_x, k_b = jax.random.split(key, 3)

    # Matches EqualLinear.__init__: weight.data.normal_(), bias.data.zero_().
    weight_orig = jax.random.normal(k_w, (out_dim, in_dim), jnp.float32)
    bias = jnp.zeros((out_dim,), jnp.float32)

    x = jax.random.normal(k_x, (batch, seq, in_dim), jnp.float32)

    out = equal_linear_forward(x, weight_orig, bias)
    out = jax.block_until_ready(out)

    assert out.shape == (batch, seq, out_dim), out.shape

    # Reference with the same compute precision as the kernel (bf16 operands,
    # f32 accumulation) -> tight tolerance.
    scale = math.sqrt(2.0 / in_dim)
    xb = x.astype(jnp.bfloat16).astype(jnp.float32)
    wb = weight_orig.astype(jnp.bfloat16).astype(jnp.float32)
    ref_bf16 = jnp.einsum("...k,nk->...n", xb, wb,
                          precision=lax.Precision.HIGHEST) * scale + bias
    ref_bf16 = jax.block_until_ready(ref_bf16)
    assert jnp.allclose(out, ref_bf16, atol=1e-3, rtol=1e-3), \
        f"max abs diff vs bf16-operand ref = {jnp.max(jnp.abs(out - ref_bf16))}"

    # Full-f32 reference (the exact PyTorch math) -> bf16-operand tolerance.
    ref_f32 = jax.block_until_ready(equal_linear_reference(x, weight_orig, bias))
    assert jnp.allclose(out, ref_f32, atol=5e-2, rtol=5e-2), \
        f"max abs diff vs f32 ref = {jnp.max(jnp.abs(out - ref_f32))}"

    print("KERNEL_OK")
</pallas_src>

<mosaic_0001>
module attributes {stable_mosaic.version = 11 : i64} {
  func.func @_equal_linear_kernel(%arg0: i32, %arg1: i32, %arg2: i32, %arg3: memref<16x32xf32, #tpu.memory_space<vmem>>, %arg4: memref<128x32xf32, #tpu.memory_space<vmem>>, %arg5: memref<1x128xf32, #tpu.memory_space<vmem>>, %arg6: memref<16x128xf32, #tpu.memory_space<vmem>>) attributes {dimension_semantics = [#tpu.dimension_semantics<parallel>, #tpu.dimension_semantics<parallel>, #tpu.dimension_semantics<arbitrary>], iteration_bounds = array<i64: 1, 1, 1>, scalar_prefetch = 0 : i64, scratch_operands = 0 : i64, tpu.core_type = #tpu.core_type<tc>, window_params = [{transform_indices = @transform_0, window_bounds = array<i64: 16, 32>}, {transform_indices = @transform_1, window_bounds = array<i64: 128, 32>}, {transform_indices = @transform_2, window_bounds = array<i64: 1, 128>}, {transform_indices = @transform_3, window_bounds = array<i64: 16, 128>}]} {
    %c0 = arith.constant 0 : index
    %c0_0 = arith.constant 0 : index
    %0 = vector.load %arg3[%c0, %c0_0] : memref<16x32xf32, #tpu.memory_space<vmem>>, vector<16x32xf32>
    %1 = arith.truncf %0 : vector<16x32xf32> to vector<16x32xbf16>
    %c0_1 = arith.constant 0 : index
    %c0_2 = arith.constant 0 : index
    %2 = vector.load %arg4[%c0_1, %c0_2] : memref<128x32xf32, #tpu.memory_space<vmem>>, vector<128x32xf32>
    %3 = arith.truncf %2 : vector<128x32xf32> to vector<128x32xbf16>
    %cst = arith.constant dense<0.000000e+00> : vector<16x128xf32>
    %4 = tpu.matmul %1, %3, %cst {dimension_numbers = #tpu.dot_dimension_numbers<[1], [1], [0], [0], [0, 0, 1, 0], [], []>} : vector<16x32xbf16>, vector<128x32xbf16>, vector<16x128xf32> -> vector<16x128xf32>
    %c0_i32 = arith.constant 0 : i32
    %5 = arith.cmpi eq, %arg2, %c0_i32 : i32
    %6 = arith.extui %5 : i1 to i32
    %c0_i32_3 = arith.constant 0 : i32
    %7 = arith.cmpi ne, %6, %c0_i32_3 : i32
    scf.if %7 {
      %c0_8 = arith.constant 0 : index
      %c0_9 = arith.constant 0 : index
      %14 = vector.load %arg6[%c0_8, %c0_9] : memref<16x128xf32, #tpu.memory_space<vmem>>, vector<16x128xf32>
      tpu.vector_store %arg6[%c0_8, %c0_9], %4 {strides = array<i32>} : memref<16x128xf32, #tpu.memory_space<vmem>>, vector<16x128xf32>,
    } else {
    }
    %c0_i32_4 = arith.constant 0 : i32
    %8 = arith.cmpi sgt, %arg2, %c0_i32_4 : i32
    %9 = arith.extui %8 : i1 to i32
    %c0_i32_5 = arith.constant 0 : i32
    %10 = arith.cmpi ne, %9, %c0_i32_5 : i32
    scf.if %10 {
      %c0_8 = arith.constant 0 : index
      %c0_9 = arith.constant 0 : index
      %14 = vector.load %arg6[%c0_8, %c0_9] : memref<16x128xf32, #tpu.memory_space<vmem>>, vector<16x128xf32>
      %15 = arith.addf %14, %4 : vector<16x128xf32>
      %c0_10 = arith.constant 0 : index
      %c0_11 = arith.constant 0 : index
      %16 = vector.load %arg6[%c0_10, %c0_11] : memref<16x128xf32, #tpu.memory_space<vmem>>, vector<16x128xf32>
      tpu.vector_store %arg6[%c0_10, %c0_11], %15 {strides = array<i32>} : memref<16x128xf32, #tpu.memory_space<vmem>>, vector<16x128xf32>,
    } else {
    }
    %c0_i32_6 = arith.constant 0 : i32
    %11 = arith.cmpi eq, %arg2, %c0_i32_6 : i32
    %12 = arith.extui %11 : i1 to i32
    %c0_i32_7 = arith.constant 0 : i32
    %13 = arith.cmpi ne, %12, %c0_i32_7 : i32
    scf.if %13 {
      %c0_8 = arith.constant 0 : index
      %c0_9 = arith.constant 0 : index
      %14 = vector.load %arg6[%c0_8, %c0_9] : memref<16x128xf32, #tpu.memory_space<vmem>>, vector<16x128xf32>
      %cst_10 = arith.constant 2.500000e-01 : f32
      %15 = vector.broadcast %cst_10 : f32 to vector<16x128xf32>
      %16 = arith.mulf %14, %15 : vector<16x128xf32>
      %c0_11 = arith.constant 0 : index
      %c0_12 = arith.constant 0 : index
      %17 = vector.load %arg5[%c0_11, %c0_12] : memref<1x128xf32, #tpu.memory_space<vmem>>, vector<1x128xf32>
      %18 = vector.broadcast %17 : vector<1x128xf32> to vector<16x128xf32>
      %19 = arith.addf %16, %18 : vector<16x128xf32>
      %c0_13 = arith.constant 0 : index
      %c0_14 = arith.constant 0 : index
      %20 = vector.load %arg6[%c0_13, %c0_14] : memref<16x128xf32, #tpu.memory_space<vmem>>, vector<16x128xf32>
      tpu.vector_store %arg6[%c0_13, %c0_14], %19 {strides = array<i32>} : memref<16x128xf32, #tpu.memory_space<vmem>>, vector<16x128xf32>,
    } else {
    }
    return
  }
  func.func @transform_0(%arg0: i32, %arg1: i32, %arg2: i32) -> (i32, i32) {
    %c0_i32 = arith.constant 0 : i32
    return %arg0, %arg2 : i32, i32
  }
  func.func @transform_1(%arg0: i32, %arg1: i32, %arg2: i32) -> (i32, i32) {
    %c0_i32 = arith.constant 0 : i32
    return %arg1, %arg2 : i32, i32
  }
  func.func @transform_2(%arg0: i32, %arg1: i32, %arg2: i32) -> (i32, i32) {
    %c0_i32 = arith.constant 0 : i32
    %c0_i32_0 = arith.constant 0 : i32
    return %c0_i32, %arg1 : i32, i32
  }
  func.func @transform_3(%arg0: i32, %arg1: i32, %arg2: i32) -> (i32, i32) {
    %c0_i32 = arith.constant 0 : i32
    return %arg0, %arg1 : i32, i32
  }
}

</mosaic_0001>

<bundles_post_ra>
// kernel: tpu_custom_call.1
= control target key start
LH: loop header
LB: loop body
LE: loop exit
PB: predicated region body
PF: predicated region fallthrough
CT: control target
= control target key end

     0   :  { %vm43_vm0 = vcmask 261120   ;;  %v222_v2 = vmov 0.0   ;;  %vm223_vm1 = vmmov 0   ;;  %s325_s0 = inlined_call_operand.vmem [shape: f32[16,32], index: 0, kind: input, shape index: {}]   ;;  %s326_s1 = inlined_call_operand.vmem [shape: f32[128,32], index: 1, kind: input, shape index: {}]   ;;  %s327_s2 = inlined_call_operand.vmem [shape: f32[1,128], index: 2, kind: input, shape index: {}]   ;;  %s328_s3 = inlined_call_operand.hbm [shape: f32[16,128], index: 3, kind: output, shape index: {}]  }
   0x1   :  { %v19_v0 = vld [vmem:[%s326_s1] sm:$0xff]  ;;  %v20_v1 = vld [vmem:[%s326_s1 + $0x8] sm:$0xff]  ;;  %173 = vmatprep.subr.bf16.mxu0 %v222_v2  ;;  %189 = vmatprep.mubr.msk.bf16.mxu0 %vm223_vm1, %v222_v2  ;;  %v21_v4 = vld [vmem:[%s326_s1 + $0x10] sm:$0xff] }
   0x2   :  { %v35_v3 = vpack.c.bf16 %v20_v1, %v19_v0  ;;  %v22_v5 = vld [vmem:[%s326_s1 + $0x18] sm:$0xff] }
   0x3   :  { %v36_v7 = vpack.c.bf16 %v22_v5, %v21_v4 }
   0x4   :  { %v48_v6 = vsel %vm43_vm0, %v35_v3, 0 }
   0x5   :  { %174 = vmatpush3.bf16.xpose.msra.mxu0 %v48_v6 }
   0x6   :  { %175 = vmatprep.subr.bf16.mxu0 %v222_v2 }
   0x7   :  { %8 = vsyncpa [#allocation3], 0  ;;  %v51_v8 = vsel %vm43_vm0, %v36_v7, 0  ;;  %v23_v9 = vld [vmem:[%s326_s1 + $0x20] sm:$0xff]  ;;  %v24_v10 = vld [vmem:[%s326_s1 + $0x28] sm:$0xff]  ;;  %s224_s22 = smov [#allocation2]  }
   0x8   :  { %v37_v11 = vpack.c.bf16 %v24_v10, %v23_v9  ;;  %v25_v13 = vld [vmem:[%s326_s1 + $0x30] sm:$0xff]  ;;  %v26_v14 = vld [vmem:[%s326_s1 + $0x38] sm:$0xff]  ;;  %v27_v17 = vld [vmem:[%s326_s1 + $0x40] sm:$0xff]  ;;  %s151_s23 = sshll.u32 %s224_s22, 4  ;;  %s152_s23 = int_to_ptr.vmem [resolvable:$true] %s151_s23 }
   0x9   :  { %v38_v15 = vpack.c.bf16 %v26_v14, %v25_v13  ;;  %v28_v18 = vld [vmem:[%s326_s1 + $0x48] sm:$0xff]  ;;  %v29_v21 = vld [vmem:[%s326_s1 + $0x50] sm:$0xff]  ;;  %v30_v22 = vld [vmem:[%s326_s1 + $0x58] sm:$0xff]  ;;  %p203_p1 = scmp.lt.s32.totalorder %s152_s23, %s152_s23 }
   0xa   :  { %v54_v12 = vsel %vm43_vm0, %v37_v11, 0  ;;  %v39_v19 = vpack.c.bf16 %v28_v18, %v27_v17  ;;  %v40_v23 = vpack.c.bf16 %v30_v22, %v29_v21  ;;  %v31_v25 = vld [vmem:[%s326_s1 + $0x60] sm:$0xff]  ;;  %v32_v26 = vld [vmem:[%s326_s1 + $0x68] sm:$0xff]  ;;  %v33_v29 = vld [vmem:[%s326_s1 + $0x70] sm:$0xff] }
   0xb   :  { %v57_v16 = vsel %vm43_vm0, %v38_v15, 0  ;;  %v41_v27 = vpack.c.bf16 %v32_v26, %v31_v25  ;;  %v34_v30 = vld [vmem:[%s326_s1 + $0x78] sm:$0xff]  ;;  %v16_v33 = vld [vmem:[%s325_s0] sm:$0xff]  ;;  %v17_v34 = vld [vmem:[%s325_s0 + $0x8] sm:$0xff]  ;;  %s198_s0 = scalar_lea.vmem %s152_s23, 256 }
   0xc   :  { %v60_v20 = vsel %vm43_vm0, %v39_v19, 0  ;;  %v63_v24 = vsel %vm43_vm0, %v40_v23, 0  ;;  %v42_v31 = vpack.c.bf16 %v34_v30, %v33_v29  ;;  %v18_v35 = vpack.c.bf16 %v17_v34, %v16_v33  ;;  %v163_v37 = vld [vmem:[%s327_s2] ss:$0 sm:$0xff]  ;;  %p199_p0 = scmp.ne.s32.totalorder %s152_s23, %s198_s0  ;;  %p204_p2 = scmp.lt.s32.totalorder %s198_s0, %s198_s0 }
   0xd   :  { %176 = vmatpush3.bf16.xpose.msra.mxu0 %v51_v8  ;;  %v66_v28 = vsel %vm43_vm0, %v41_v27, 0 }
   0xe   :  { %177 = vmatprep.subr.bf16.mxu0 %v222_v2  ;;  %v69_v32 = vsel %vm43_vm0, %v42_v31, 0  ;;  %p205_p3 = por %p204_p2, %p203_p1 }
  0x10   :  { %p206_p4 = pnand %p205_p3, %p199_p0 }
  0x15   :  { %178 = vmatpush3.bf16.xpose.msra.mxu0 %v54_v12 }
  0x16   :  { %179 = vmatprep.subr.bf16.mxu0 %v222_v2 }
  0x1d   :  { %180 = vmatpush3.bf16.xpose.msra.mxu0 %v57_v16 }
  0x1e   :  { %181 = vmatprep.subr.bf16.mxu0 %v222_v2 }
  0x25   :  { %182 = vmatpush3.bf16.xpose.msra.mxu0 %v60_v20 }
  0x26   :  { %183 = vmatprep.subr.bf16.mxu0 %v222_v2 }
  0x2d   :  { %184 = vmatpush3.bf16.xpose.msra.mxu0 %v63_v24 }
  0x2e   :  { %185 = vmatprep.subr.bf16.mxu0 %v222_v2 }
  0x35   :  { %186 = vmatpush3.bf16.xpose.msra.mxu0 %v66_v28 }
  0x36   :  { %187 = vmatprep.subr.bf16.mxu0 %v222_v2 }
  0x3d   :  { %188 = vmatpush3.bf16.xpose.msra.mxu0 %v69_v32 }
  0x44   :  { %190 = vmatmul.mubr.msk.bf16.vlgmr.msra.gmra.mrb[0].mxu0 %vm43_vm0, %v18_v35 }
 0x117   :  { %v105_v36 = vpop.f32.mrb[0].mxu0 }
 0x118   :  { %v133_v38 = vmul.f32 0.25, %v105_v36  ;;  %v191_v39 = vpop.f32.mrb[1].mxu0 }
 0x119   :  { %v108_v40 = vpop.f32.mrb[2].mxu0 }
 0x11a   :  { %v142_v41 = vadd.f32 %v163_v37, %v133_v38  ;;  %v134_v42 = vmul.f32 0.25, %v108_v40  ;;  %v192_v43 = vpop.f32.mrb[3].mxu0 }
 0x11c   :  { %144 = vst [vmem:[#allocation2] sm:$0xff] %v142_v41  ;;  %v143_v44 = vadd.f32 %v163_v37, %v134_v42 }
 0x11e   :  { %145 = vst [vmem:[#allocation2 + $0x8] sm:$0xff] %v143_v44 }
 0x11f   :  { %209 = shalt.err (!%p206_p4)
}
 0x120   :  { %s210_s25 = scalar_lea.hbm %s328_s3, 256 }
 0x121   :  { %p211_p5 = scmp.ne.s32.totalorder %s328_s3, %s210_s25  ;;  %p214_p6 = scmp.lt.u32.totalorder %s210_s25, %s328_s3 }
 0x123   :  { %p216_p7 = pnand %p214_p6, %p211_p5 }
 0x125   :  { %219 = shalt.err (!%p216_p7)
}
 0x126   :  { %s225_s30 = smov 128   ;;  %s226_s4 = smov 8  }
 0x127   :  { %157 = dma.vmem_to_hbm [thread:$0]  %s152_s23, 256, %s328_s3, [#allocation3], %s225_s30, %s225_s30, %s226_s4  }
 0x128   :  { %220 = dma.done.wait [#allocation3], 256  }
 0x129   :  { %221 = vsyncadd [#allocation3], 4294967040 }
 0x12a   :  { %161 = vsyncpa [#allocation3], 1 }

</bundles_post_ra>
